<compile_context>
chip_gen: v7x
topology: tpu7x:2x2x1
jax: 0.10.0
libtpu: 0.0.40
codegen_flags: <defaults>
</compile_context>

<pallas_src>
import functools

import jax
import jax.numpy as jnp
from jax import lax
from jax.experimental import pallas as pl
from jax.experimental.pallas import tpu as pltpu


def mha_kernel(x_ref, wqkv_ref, wo_ref, bo_ref, o_ref, acc_ref,
               *, head_size, q_block, compute_dtype):
    # x_ref:    (1, T, C)        whole sequence for this batch element
    # wqkv_ref: (1, C, 3*hs)     per-head [Wq_h | Wk_h | Wv_h], compute_dtype
    # wo_ref:   (1, hs, C)       per-head rows of the output projection
    # bo_ref:   (1, C)           output-projection bias (f32)
    # o_ref:    (1, tq, C)       output tile
    # acc_ref:  (tq, C) f32      output-projection accumulator (over heads)
    qi = pl.program_id(1)
    h = pl.program_id(2)
    num_heads = pl.num_programs(2)
    T = x_ref.shape[1]

    @pl.when(h == 0)
    def _init():
        acc_ref[...] = jnp.zeros_like(acc_ref)

    # Activations (cast once to the MXU compute dtype).
    x_all = x_ref[0].astype(compute_dtype)                              # (T, C)
    q_start = pl.multiple_of(qi * q_block, q_block)
    x_q = x_ref[0, pl.ds(q_start, q_block), :].astype(compute_dtype)    # (tq, C)

    wqkv = wqkv_ref[0]                                                  # (C, 3*hs)

    # Fused per-head projections (bf16 operands, f32 accumulation).
    q = jnp.dot(x_q, wqkv[:, :head_size],
                preferred_element_type=jnp.float32)                     # (tq, hs)
    kv = jnp.dot(x_all, wqkv[:, head_size:],
                 preferred_element_type=jnp.float32)                    # (T, 2*hs)
    k = kv[:, :head_size]
    v = kv[:, head_size:]

    # Scores: q @ k^T (contract on head dim, no explicit transpose).
    scale = head_size ** -0.5
    s = lax.dot_general(q.astype(compute_dtype), k.astype(compute_dtype),
                        (((1,), (1,)), ((), ())),
                        preferred_element_type=jnp.float32) * scale     # (tq, T)

    # Causal mask with the global row offset of this q tile.
    row = lax.broadcasted_iota(jnp.int32, (q_block, T), 0) + qi * q_block
    col = lax.broadcasted_iota(jnp.int32, (q_block, T), 1)
    s = jnp.where(col <= row, s, -jnp.inf)

    # Numerically-stable softmax in f32; reciprocal goes to the EUP.
    s = s - jnp.max(s, axis=-1, keepdims=True)
    p = jnp.exp(s)
    p = p * pl.reciprocal(jnp.sum(p, axis=-1, keepdims=True), approx=True)

    att = jnp.dot(p.astype(compute_dtype), v.astype(compute_dtype),
                  preferred_element_type=jnp.float32)                   # (tq, hs)

    # Fold this head straight into the output projection (no concat needed):
    #   concat_h(att_h) @ Wo == sum_h att_h @ Wo[h*hs:(h+1)*hs, :]
    acc_ref[...] += jnp.dot(att.astype(compute_dtype), wo_ref[0],
                            preferred_element_type=jnp.float32)         # (tq, C)

    @pl.when(h == num_heads - 1)
    def _finalize():
        o_ref[0] = (acc_ref[...] + bo_ref[...]).astype(o_ref.dtype)


def multi_head_attention(x, wq, wk, wv, wo, bo, *, num_heads,
                         q_block=None, compute_dtype=jnp.bfloat16):
    """x: (B, T, C); wq/wk/wv/wo: (C, C) in (in, out) layout; bo: (C,)."""
    B, T, C = x.shape
    H = num_heads
    hs = C // H
    if q_block is None:
        q_block = min(T, 128)
    assert T % q_block == 0 and (q_block % 8 == 0 or q_block == T)

    def per_head_cols(w):
        # (C, C) -> (H, C, hs); head h gets columns [h*hs, (h+1)*hs).
        return jnp.transpose(w.reshape(C, H, hs), (1, 0, 2))

    # Fused per-head QKV weights: (H, C, 3*hs), already in the MXU compute dtype.
    wqkv = jnp.concatenate(
        [per_head_cols(wq), per_head_cols(wk), per_head_cols(wv)],
        axis=-1).astype(compute_dtype)
    wo_h = wo.reshape(H, hs, C).astype(compute_dtype)          # (H, hs, C)
    bo2 = bo.reshape(1, C).astype(jnp.float32)

    kernel = functools.partial(mha_kernel, head_size=hs, q_block=q_block,
                               compute_dtype=compute_dtype)

    grid = (B, T // q_block, H)      # head axis last (reduction into acc)
    return pl.pallas_call(
        kernel,
        out_shape=jax.ShapeDtypeStruct((B, T, C), x.dtype),
        grid_spec=pltpu.PrefetchScalarGridSpec(
            num_scalar_prefetch=0,
            grid=grid,
            in_specs=[
                pl.BlockSpec((1, T, C), lambda b, qi, h: (b, 0, 0)),       # x
                pl.BlockSpec((1, C, 3 * hs), lambda b, qi, h: (h, 0, 0)),  # Wq|Wk|Wv per head
                pl.BlockSpec((1, hs, C), lambda b, qi, h: (h, 0, 0)),      # Wo rows per head
                pl.BlockSpec((1, C), lambda b, qi, h: (0, 0)),             # proj bias
            ],
            out_specs=pl.BlockSpec((1, q_block, C), lambda b, qi, h: (b, qi, 0)),
            scratch_shapes=[pltpu.VMEM((q_block, C), jnp.float32)],
        ),
        compiler_params=pltpu.CompilerParams(
            dimension_semantics=("parallel", "parallel", "arbitrary")),
    )(x, wqkv, wo_h, bo2)


def reference_mha(x, wq, wk, wv, wo, bo, *, num_heads):
    """Pure-JAX reference mirroring the PyTorch module (dropout disabled)."""
    B, T, C = x.shape
    hs = C // num_heads
    q = x @ wq
    k = x @ wk
    v = x @ wv
    mask = jnp.tril(jnp.ones((T, T), dtype=bool))
    outs = []
    for h in range(num_heads):
        lo, hi = h * hs, (h + 1) * hs
        wei = (q[..., lo:hi] @ jnp.swapaxes(k[..., lo:hi], -1, -2)) * hs ** -0.5
        wei = jnp.where(mask, wei, -jnp.inf)
        wei = jax.nn.softmax(wei, axis=-1)
        outs.append(wei @ v[..., lo:hi])
    att = jnp.concatenate(outs, axis=-1)
    return att @ wo + bo


if __name__ == "__main__":
    # Small, module-consistent shapes: batch=2, seq=16, n_embed=32, num_heads=4.
    B, T, C = 2, 16, 32
    num_heads = 4

    key = jax.random.PRNGKey(0)
    kx, kq, kk, kv_, ko, kb = jax.random.split(key, 6)

    x = jax.random.normal(kx, (B, T, C), dtype=jnp.float32)
    # Weights already in (in, out) layout (== PyTorch weight.T), concatenated over heads.
    wq = jax.random.normal(kq, (C, C), dtype=jnp.float32) * 0.1
    wk = jax.random.normal(kk, (C, C), dtype=jnp.float32) * 0.1
    wv = jax.random.normal(kv_, (C, C), dtype=jnp.float32) * 0.1
    wo = jax.random.normal(ko, (C, C), dtype=jnp.float32) * 0.1
    bo = jax.random.normal(kb, (C,), dtype=jnp.float32) * 0.1

    q_block = 8   # 2 q-tiles -> exercises tiled causal masking + wider grid

    # Primary (performance) path: bf16 MXU operands, f32 accumulation.
    out_bf16 = multi_head_attention(x, wq, wk, wv, wo, bo, num_heads=num_heads,
                                    q_block=q_block, compute_dtype=jnp.bfloat16)
    out_bf16 = jax.block_until_ready(out_bf16)

    # Structural-correctness path: same kernel in f32 compute.
    out_f32 = multi_head_attention(x, wq, wk, wv, wo, bo, num_heads=num_heads,
                                   q_block=q_block, compute_dtype=jnp.float32)
    out_f32 = jax.block_until_ready(out_f32)

    ref = reference_mha(x, wq, wk, wv, wo, bo, num_heads=num_heads)

    assert out_bf16.shape == (B, T, C)
    assert jnp.allclose(out_f32, ref, atol=5e-3, rtol=5e-3), "f32-path mismatch vs reference"
    assert jnp.allclose(out_bf16, ref, atol=3e-2, rtol=3e-2), "bf16-path mismatch vs reference"

    print("KERNEL_OK")
</pallas_src>

<mosaic_0001>
module attributes {stable_mosaic.version = 11 : i64} {
  func.func @mha_kernel(%arg0: i32, %arg1: i32, %arg2: i32, %arg3: memref<1x16x32xf32, #tpu.memory_space<vmem>>, %arg4: memref<1x32x24xbf16, #tpu.memory_space<vmem>>, %arg5: memref<1x8x32xbf16, #tpu.memory_space<vmem>>, %arg6: memref<1x32xf32, #tpu.memory_space<vmem>>, %arg7: memref<1x8x32xf32, #tpu.memory_space<vmem>>, %arg8: memref<8x32xf32, #tpu.memory_space<vmem>>) attributes {dimension_semantics = [#tpu.dimension_semantics<parallel>, #tpu.dimension_semantics<parallel>, #tpu.dimension_semantics<arbitrary>], iteration_bounds = array<i64: 2, 2, 4>, scalar_prefetch = 0 : i64, scratch_operands = 1 : i64, tpu.core_type = #tpu.core_type<tc>, window_params = [{transform_indices = @transform_0, window_bounds = array<i64: 1, 16, 32>}, {transform_indices = @transform_1, window_bounds = array<i64: 1, 32, 24>}, {transform_indices = @transform_2, window_bounds = array<i64: 1, 8, 32>}, {pipeline_mode = #tpu.pipeline_mode<synchronous>, transform_indices = @transform_3, window_bounds = array<i64: 1, 32>}, {transform_indices = @transform_4, window_bounds = array<i64: 1, 8, 32>}]} {
    %c0_i32 = arith.constant 0 : i32
    %0 = arith.cmpi eq, %arg2, %c0_i32 : i32
    %1 = arith.extui %0 : i1 to i32
    %c0_i32_0 = arith.constant 0 : i32
    %2 = arith.cmpi ne, %1, %c0_i32_0 : i32
    scf.if %2 {
      %cst_25 = arith.constant 0.000000e+00 : f32
      %56 = vector.broadcast %cst_25 : f32 to vector<8x32xf32>
      %c0_26 = arith.constant 0 : index
      %c0_27 = arith.constant 0 : index
      %57 = vector.load %arg8[%c0_26, %c0_27] : memref<8x32xf32, #tpu.memory_space<vmem>>, vector<8x32xf32>
      tpu.vector_store %arg8[%c0_26, %c0_27], %56 {strides = array<i32>} : memref<8x32xf32, #tpu.memory_space<vmem>>, vector<8x32xf32>,
    } else {
    }
    %c0 = arith.constant 0 : index
    %c0_1 = arith.constant 0 : index
    %c0_2 = arith.constant 0 : index
    %3 = vector.load %arg3[%c0, %c0_1, %c0_2] : memref<1x16x32xf32, #tpu.memory_space<vmem>>, vector<1x16x32xf32>
    %4 = vector.shape_cast %3 : vector<1x16x32xf32> to vector<16x32xf32>
    %5 = arith.truncf %4 : vector<16x32xf32> to vector<16x32xbf16>
    %c8_i32 = arith.constant 8 : i32
    %6 = arith.muli %arg1, %c8_i32 : i32
    %7 = tpu.assume_multiple %6, 8 : i32
    %c0_3 = arith.constant 0 : index
    %8 = arith.index_cast %7 : i32 to index
    %c0_4 = arith.constant 0 : index
    %9 = vector.load %arg3[%c0_3, %8, %c0_4] : memref<1x16x32xf32, #tpu.memory_space<vmem>>, vector<1x8x32xf32>
    %10 = vector.shape_cast %9 : vector<1x8x32xf32> to vector<8x32xf32>
    %11 = arith.truncf %10 : vector<8x32xf32> to vector<8x32xbf16>
    %c0_5 = arith.constant 0 : index
    %c0_6 = arith.constant 0 : index
    %c0_7 = arith.constant 0 : index
    %12 = vector.load %arg4[%c0_5, %c0_6, %c0_7] : memref<1x32x24xbf16, #tpu.memory_space<vmem>>, vector<1x32x24xbf16>
    %13 = vector.shape_cast %12 : vector<1x32x24xbf16> to vector<32x24xbf16>
    %14 = vector.extract_strided_slice %13 {offsets = [0, 0], sizes = [32, 8], strides = [1, 1]} : vector<32x24xbf16> to vector<32x8xbf16>
    %cst = arith.constant dense<0.000000e+00> : vector<8x8xf32>
    %15 = tpu.matmul %11, %14, %cst {dimension_numbers = #tpu.dot_dimension_numbers<[1], [0], [0], [1], [0, 0, 1, 1], [], []>} : vector<8x32xbf16>, vector<32x8xbf16>, vector<8x8xf32> -> vector<8x8xf32>
    %16 = vector.extract_strided_slice %13 {offsets = [0, 8], sizes = [32, 16], strides = [1, 1]} : vector<32x24xbf16> to vector<32x16xbf16>
    %cst_8 = arith.constant dense<0.000000e+00> : vector<16x16xf32>
    %17 = tpu.matmul %5, %16, %cst_8 {dimension_numbers = #tpu.dot_dimension_numbers<[1], [0], [0], [1], [0, 0, 1, 1], [], []>} : vector<16x32xbf16>, vector<32x16xbf16>, vector<16x16xf32> -> vector<16x16xf32>
    %18 = vector.extract_strided_slice %17 {offsets = [0, 0], sizes = [16, 8], strides = [1, 1]} : vector<16x16xf32> to vector<16x8xf32>
    %19 = vector.extract_strided_slice %17 {offsets = [0, 8], sizes = [16, 8], strides = [1, 1]} : vector<16x16xf32> to vector<16x8xf32>
    %20 = arith.truncf %15 : vector<8x8xf32> to vector<8x8xbf16>
    %21 = arith.truncf %18 : vector<16x8xf32> to vector<16x8xbf16>
    %cst_9 = arith.constant dense<0.000000e+00> : vector<8x16xf32>
    %22 = tpu.matmul %20, %21, %cst_9 {dimension_numbers = #tpu.dot_dimension_numbers<[1], [1], [0], [0], [0, 0, 1, 0], [], []>} : vector<8x8xbf16>, vector<16x8xbf16>, vector<8x16xf32> -> vector<8x16xf32>
    %cst_10 = arith.constant 0.353553385 : f32
    %23 = vector.broadcast %cst_10 : f32 to vector<8x16xf32>
    %24 = arith.mulf %22, %23 : vector<8x16xf32>
    %25 = tpu.iota {dimensions = array<i32: 0>} : vector<8x16xi32>
    %c8_i32_11 = arith.constant 8 : i32
    %26 = arith.muli %arg1, %c8_i32_11 : i32
    %27 = vector.broadcast %26 : i32 to vector<8x16xi32>
    %28 = arith.addi %25, %27 : vector<8x16xi32>
    %29 = tpu.iota {dimensions = array<i32: 1>} : vector<8x16xi32>
    %30 = arith.cmpi sle, %29, %28 : vector<8x16xi32>
    %cst_12 = arith.constant 0xFF800000 : f32
    %31 = vector.broadcast %cst_12 : f32 to vector<8x16xf32>
    %32 = arith.select %30, %24, %31 : vector<8x16xi1>, vector<8x16xf32>
    %cst_13 = arith.constant dense<0xFF800000> : vector<8xf32>
    %33 = vector.multi_reduction <maximumf>, %32, %cst_13 [1] : vector<8x16xf32> to vector<8xf32>
    %34 = vector.shape_cast %33 : vector<8xf32> to vector<8x1xf32>
    %35 = vector.broadcast %34 : vector<8x1xf32> to vector<8x16xf32>
    %36 = arith.subf %32, %35 : vector<8x16xf32>
    %37 = math.exp %36 : vector<8x16xf32>
    %cst_14 = arith.constant dense<0.000000e+00> : vector<8xf32>
    %38 = vector.multi_reduction <add>, %37, %cst_14 [1] : vector<8x16xf32> to vector<8xf32>
    %39 = vector.shape_cast %38 : vector<8xf32> to vector<8x1xf32>
    %40 = tpu.reciprocal %39 {approx = true} : vector<8x1xf32> -> vector<8x1xf32>
    %41 = vector.broadcast %40 : vector<8x1xf32> to vector<8x16xf32>
    %42 = arith.mulf %37, %41 : vector<8x16xf32>
    %43 = arith.truncf %42 : vector<8x16xf32> to vector<8x16xbf16>
    %44 = arith.truncf %19 : vector<16x8xf32> to vector<16x8xbf16>
    %cst_15 = arith.constant dense<0.000000e+00> : vector<8x8xf32>
    %45 = tpu.matmul %43, %44, %cst_15 {dimension_numbers = #tpu.dot_dimension_numbers<[1], [0], [0], [1], [0, 0, 1, 1], [], []>} : vector<8x16xbf16>, vector<16x8xbf16>, vector<8x8xf32> -> vector<8x8xf32>
    %c0_16 = arith.constant 0 : index
    %c0_17 = arith.constant 0 : index
    %46 = vector.load %arg8[%c0_16, %c0_17] : memref<8x32xf32, #tpu.memory_space<vmem>>, vector<8x32xf32>
    %47 = arith.truncf %45 : vector<8x8xf32> to vector<8x8xbf16>
    %c0_18 = arith.constant 0 : index
    %c0_19 = arith.constant 0 : index
    %c0_20 = arith.constant 0 : index
    %48 = vector.load %arg5[%c0_18, %c0_19, %c0_20] : memref<1x8x32xbf16, #tpu.memory_space<vmem>>, vector<1x8x32xbf16>
    %49 = vector.shape_cast %48 : vector<1x8x32xbf16> to vector<8x32xbf16>
    %cst_21 = arith.constant dense<0.000000e+00> : vector<8x32xf32>
    %50 = tpu.matmul %47, %49, %cst_21 {dimension_numbers = #tpu.dot_dimension_numbers<[1], [0], [0], [1], [0, 0, 1, 1], [], []>} : vector<8x8xbf16>, vector<8x32xbf16>, vector<8x32xf32> -> vector<8x32xf32>
    %51 = arith.addf %46, %50 : vector<8x32xf32>
    %c0_22 = arith.constant 0 : index
    %c0_23 = arith.constant 0 : index
    %52 = vector.load %arg8[%c0_22, %c0_23] : memref<8x32xf32, #tpu.memory_space<vmem>>, vector<8x32xf32>
    tpu.vector_store %arg8[%c0_22, %c0_23], %51 {strides = array<i32>} : memref<8x32xf32, #tpu.memory_space<vmem>>, vector<8x32xf32>,
    %c3_i32 = arith.constant 3 : i32
    %53 = arith.cmpi eq, %arg2, %c3_i32 : i32
    %54 = arith.extui %53 : i1 to i32
    %c0_i32_24 = arith.constant 0 : i32
    %55 = arith.cmpi ne, %54, %c0_i32_24 : i32
    scf.if %55 {
      %c0_25 = arith.constant 0 : index
      %c0_26 = arith.constant 0 : index
      %56 = vector.load %arg8[%c0_25, %c0_26] : memref<8x32xf32, #tpu.memory_space<vmem>>, vector<8x32xf32>
      %c0_27 = arith.constant 0 : index
      %c0_28 = arith.constant 0 : index
      %57 = vector.load %arg6[%c0_27, %c0_28] : memref<1x32xf32, #tpu.memory_space<vmem>>, vector<1x32xf32>
      %58 = vector.broadcast %57 : vector<1x32xf32> to vector<8x32xf32>
      %59 = arith.addf %56, %58 : vector<8x32xf32>
      %c0_29 = arith.constant 0 : index
      %c0_30 = arith.constant 0 : index
      %c0_31 = arith.constant 0 : index
      %60 = vector.load %arg7[%c0_29, %c0_30, %c0_31] : memref<1x8x32xf32, #tpu.memory_space<vmem>>, vector<1x8x32xf32>
      %61 = vector.shape_cast %60 : vector<1x8x32xf32> to vector<8x32xf32>
      %62 = vector.shape_cast %59 : vector<8x32xf32> to vector<1x8x32xf32>
      tpu.vector_store %arg7[%c0_29, %c0_30, %c0_31], %62 {strides = array<i32>} : memref<1x8x32xf32, #tpu.memory_space<vmem>>, vector<1x8x32xf32>,
    } else {
    }
    return
  }
  func.func @transform_0(%arg0: i32, %arg1: i32, %arg2: i32) -> (i32, i32, i32) {
    %c0_i32 = arith.constant 0 : i32
    %c0_i32_0 = arith.constant 0 : i32
    %c0_i32_1 = arith.constant 0 : i32
    return %arg0, %c0_i32, %c0_i32_0 : i32, i32, i32
  }
  func.func @transform_1(%arg0: i32, %arg1: i32, %arg2: i32) -> (i32, i32, i32) {
    %c0_i32 = arith.constant 0 : i32
    %c0_i32_0 = arith.constant 0 : i32
    %c0_i32_1 = arith.constant 0 : i32
    return %arg2, %c0_i32, %c0_i32_0 : i32, i32, i32
  }
  func.func @transform_2(%arg0: i32, %arg1: i32, %arg2: i32) -> (i32, i32, i32) {
    %c0_i32 = arith.constant 0 : i32
    %c0_i32_0 = arith.constant 0 : i32
    %c0_i32_1 = arith.constant 0 : i32
    return %arg2, %c0_i32, %c0_i32_0 : i32, i32, i32
  }
  func.func @transform_3(%arg0: i32, %arg1: i32, %arg2: i32) -> (i32, i32) {
    %c0_i32 = arith.constant 0 : i32
    %c0_i32_0 = arith.constant 0 : i32
    %c0_i32_1 = arith.constant 0 : i32
    return %c0_i32, %c0_i32_0 : i32, i32
  }
  func.func @transform_4(%arg0: i32, %arg1: i32, %arg2: i32) -> (i32, i32, i32) {
    %c0_i32 = arith.constant 0 : i32
    %c0_i32_0 = arith.constant 0 : i32
    return %arg0, %arg1, %c0_i32 : i32, i32, i32
  }
}

</mosaic_0001>

<bundles_post_ra>
// kernel: tpu_custom_call.1
= control target key start
LH: loop header
LB: loop body
LE: loop exit
PB: predicated region body
PF: predicated region fallthrough
CT: control target
= control target key end

     0   :  { %9 = vsyncpa [#allocation4], 0  ;;  %s1199_s0 = inlined_call_operand.vmem [shape: f32[2,16,32], index: 0, kind: input, shape index: {}]   ;;  %s1200_s1 = inlined_call_operand.vmem [shape: bf16[4,32,24], index: 1, kind: input, shape index: {}]   ;;  %s1201_s2 = inlined_call_operand.vmem [shape: bf16[4,8,32], index: 2, kind: input, shape index: {}]   ;;  %s1202_s3 = inlined_call_operand.vmem [shape: f32[1,32], index: 3, kind: input, shape index: {}]   ;;  %s1203_s4 = inlined_call_operand.hbm [shape: f32[2,16,32], index: 4, kind: output, shape index: {}]  }
   0x1   :  { %11 = vsyncpa [#allocation4 + $0x1], 0  ;;  %s996_s15 = smov 0   ;;  %s998_s16 = smov 0  }
   0x2   :  { %s1000_s17 = smov 0   ;;  %s1002_s18 = smov 0  }
   0x3   :  { %s1004_s19 = smov 0   ;;  %s1006_s20 = smov 0  }
   0x4   :  { %s1008_s21 = smov 0   ;;  %s1010_s22 = smov 0  }
   0x5   :  { %s1012_s23 = smov 0   ;;  %s1014_s24 = smov 0  }
   0x6 LB: > { %1210 = sst [smem:[#allocation6_spill]] %s952_s21  ;;  %s682_s25 = sadd.s32 4294967295, %s964_s24   ;;  %s964_s24 = sphi %s1014_s24, %s17_s24   ;;  %s960_s23 = sphi %s1012_s23, %s1224_s23   ;;  %s956_s22 = sphi %s1010_s22, %s1223_s22   ;;  %s952_s21 = sphi %s1008_s21, %s1222_s21   ;;  %s948_s20 = sphi %s1006_s20, %s1221_s20   ;;  %s944_s19 = sphi %s1004_s19, %s1220_s19   ;;  %s940_s18 = sphi %s1002_s18, %s1219_s18   ;;  %s936_s17 = sphi %s1000_s17, %s1227_s17   ;;  %s932_s16 = sphi %s998_s16, %s1226_s16   ;;  %s928_s15 = sphi %s996_s15, %s1225_s15  }
   0x7   : > { %1211 = sst [smem:[#allocation7_spill]] %s956_s22  ;;  %s683_s26 = sadd.s32 4294967294, %s964_s24  }
   0x8   : > { %1212 = sst [smem:[#allocation8_spill]] %s960_s23  ;;  %s29_s27 = sadd.s32 1, %s952_s21 }
   0x9   : > { %p30_p0 = scmp.ge.s32.totalorder %s29_s27, 4  ;;  %s32_s28 = sadd.s32 1, %s956_s22 }
   0xa   : > { %s36_s29 = sadd.s32 1, %s960_s23  ;;  %p154_p1 = scmp.ne.s32.totalorder %s936_s17, %s932_s16 }
   0xb   : > { %s1229_s27 = smov (%p30_p0, %s29_s27), 0  ;;  %s1231_s28 = smov (!%p30_p0, %s32_s28), %s956_s22 }
   0xc   : > { %1213 = sst [smem:[#allocation9_spill]] %s1229_s27  ;;  %p155_p2 = scmp.eq.s32.totalorder %s682_s25, 15 }
   0xd   : > { %p160_p3 = scmp.ne.s32.totalorder %s932_s16, %s928_s15  ;;  %p34_p4 = scmp.ge.s32.totalorder %s1231_s28, 2 }
   0xe   : > { %p161_p5 = scmp.eq.s32.totalorder %s683_s26, 15  ;;  %p1058_p6 = por %p155_p2, %p154_p1 }
   0xf   : > { %s1233_s28 = smov (%p34_p4, %s1231_s28), 0  ;;  %s1235_s29 = smov (!%p34_p4, %s36_s29), %s960_s23 }
  0x10   : > { %1215 = sst [smem:[#allocation10_spill]] %s1233_s28  ;;  %p1065_p7 = por %p161_p5, %p160_p3 }
  0x11   : > { %p686_p8 = scmp.ge.s32.totalorder %s964_s24, 1  ;;  %p38_p9 = scmp.ge.s32.totalorder %s1235_s29, 2 }
  0x12   : > { %p205_p10 = scmp.lt.s32.totalorder %s964_s24, 17  ;;  %s140_s6 = ssub.s32 %s956_s22, %s1233_s28 }
  0x13   : > { %s1237_s29 = smov (%p38_p9, %s1235_s29), 0  ;;  %s144_s9 = sadd.s32 1, %s936_s17 }
  0x14   : > { %1217 = sst [smem:[#allocation11_spill]] %s1237_s29  ;;  %p206_p11 = pnand %p686_p8, %p205_p10 }
  0x15   : > { %s139_s7 = ssub.s32 %s960_s23, %s1237_s29  ;;  %s1208_s11 = sand.u32 (!%p206_p11), 1, %s932_s16  }
  0x16   : > { %s141_s8 = sor.u32 %s140_s6, %s139_s7  ;;  %209 = sbr.rel (%p206_p11) target bundleno = 1381 (0x565), region = 36 }
  0x17   : > { %p142_p12 = scmp.eq.s32.totalorder %s141_s8, 0  ;;  %p240_p13 = scmp.lt.s32.totalorder (!%p206_p11), %s948_s20, 1 }
  0x18   : > { %s1085_s12 = sshll.u32 (!%p206_p11), %s1208_s11, 3  ;;  %p245_p0 = scmp.lt.s32.totalorder (!%p206_p11), %s940_s18, 3 }
  0x19   : > { %s1079_s10 = scalar_select %p142_p12, %s936_s17, %s144_s9  }
  0x1a   : > { %s239_s21 = scalar_lea.vmem (!%p206_p11), [#allocation3], %s1085_s12  ;;  %p693_p1 = scmp.ne.s32.totalorder (!%p206_p11), %s940_s18, 0 }
  0x1d   : > { %s241_s13 = scalar_select %p240_p13, %s948_s20, 1 }
  0x1e   : > { %s246_s14 = scalar_select %p245_p0, %s940_s18, 3 }
  0x1f   : > { %s709_s25 = sshll.u32 %s241_s13, 4  ;;  %258 = sbr.rel (%p693_p1) target bundleno = 38 (0x26), region = 40  ;;  %vm259_vm0 = vcmask (!%p693_p1), 261120   ;;  %v966_v0 = vmov (!%p693_p1), 0.0  }
  0x20   : > { %s1093_s7 = scalar_lea.vmem %s1199_s0, %s709_s25  ;;  %s710_s8 = sshll.u32 %s246_s14, 4  ;;  %260 = vst.msk [vmem:[#allocation2] sm:$0xff] (!%p693_p1), %vm259_vm0, %v966_v0 }
  0x21   : > { %s249_s28 = scalar_lea.vmem %s1200_s1, %s710_s8  ;;  %s692_s27 = sshll.u32 %s246_s14, 2 }
  0x22   : > { %s1101_s11 = scalar_lea.vmem %s1201_s2, %s692_s27 }
  0x26 PF: > { %v848_v1 = vld [vmem:[%s249_s28] sm:$0xff]   ;;  %s967_s29 = smov 120   ;;  %v849_v2 = vld [vmem:[%s249_s28 + $0x8] sm:$0xff]   ;;  %v968_v3 = vmov 0.0   ;;  %s694_s22 = sshll.u32 %s944_s19, 3  ;;  %vm969_vm1 = vmmov 0   ;;  %v428_v23 = vlaneseq }
  0x27   : > { %328 = vrot.lane.b32.xlu0 %v848_v1, %s967_s29  ;;  %731 = vmatprep.subr.bf16.mxu1 %v968_v3  ;;  %s265_s23 = scalar_lea.vmem %s1093_s7, %s694_s22  ;;  %vm284_vm2 = vcmask 261120   ;;  %v261_v7 = vld [vmem:[%s1093_s7] sm:$0xff]  ;;  %v262_v8 = vld [vmem:[%s1093_s7 + $0x8] sm:$0xff]  ;;  %vm380_vm3 = vcmask 64512   ;;  %v430_v25 = vstv %s694_s22  ;;  %vm436_vm5 = vcmask 130048   ;;  %p702_p2 = scmp.ne.s32.totalorder %s940_s18, 3 }
  0x28   : > { %735 = vmatprep.mubr.msk.bf16.mxu1 %vm969_vm1, %v968_v3  ;;  %723 = vmatprep.subr.bf16.mxu0 %v968_v3  ;;  %v266_v4 = vld [vmem:[%s265_s23] sm:$0xff]  ;;  %v263_v10 = vpack.c.bf16 %v262_v8, %v261_v7  ;;  %v429_v24 = vshrl.u32 %v428_v23, 7  ;;  %v433_v27 = vand.u32 127, %v428_v23  ;;  %vm502_vm6 = vcmask 1043456  }
  0x29   : > { %724 = vmatpush3.bf16.msra.mxu0 %v848_v1  ;;  %727 = vmatprep.mubr.msk.bf16.mxu0 %vm969_vm1, %v968_v3  ;;  %v267_v5 = vpack.c.bf16 %v266_v4, %v266_v4  ;;  %v498_v40 = vld [vmem:[%s1101_s11] sm:$0xf] }
  0x2a   : > { %725 = vmatprep.subr.bf16.mxu0 %v968_v3  ;;  %v431_v26 = vadd.s32 %v430_v25, %v429_v24  ;;  %v504_v41 = vsel %vm502_vm6, %v498_v40, 0  ;;  %v496_v51 = vld [vmem:[#allocation2] sm:$0xff] }
  0x2b   : > { %330 = vrot.lane.b32.xlu0 %v849_v2, %s967_s29  ;;  %v703_v58 = vld [vmem:[%s1202_s3] ss:$0 sm:$0xff] (!%p702_p2) }
  0x2c   : > { %vm434_vm4 = vcmp.le.s32.totalorder %v433_v27, %v431_v26 }
  0x2d   : > { %726 = vmatpush3.bf16.msra.mxu0 %v849_v2 }
  0x2e   : > { %739 = vmatprep.subr.bf16.mxu0 %v968_v3 }
  0x30   : > { %728 = vmatmul.mubr.msk.bf16.vlgmr.msra.gmra.mrb[0].mxu0 %vm284_vm2, %v267_v5 }
  0x31   : > { %741 = vmatprep.mubr.msk.bf16.mxu0 %vm969_vm1, %v968_v3 }
  0x99   : > { %v329_v6 = vpop.permute.xlu0 %328 }
  0x9a   : > { %732 = vmatpush3.bf16.msra.mxu1 %v329_v6 }
  0x9b   : > { %733 = vmatprep.subr.bf16.mxu1 %v968_v3 }
  0x9d   : > { %v331_v9 = vpop.permute.xlu0 %330 }
  0x9e   : > { %734 = vmatpush3.bf16.msra.mxu1 %v331_v9 }
  0x9f   : > { %745 = vmatprep.subr.bf16.mxu1 %v968_v3 }
  0xa1   : > { %736 = vmatmul.mubr.msk.bf16.vlgmr.msra.gmra.mrb[0].mxu1 %vm284_vm2, %v263_v10 }
  0xa2   : > { %747 = vmatprep.mubr.msk.bf16.mxu1 %vm969_vm1, %v968_v3 }
 0x103   : > { %v322_v11 = vpop.f32.mrb[0].mxu0 }
 0x104   : > { %v729_v12 = vpop.f32.mrb[1].mxu0  ;;  %v378_v21 = vpack.c.bf16 %v322_v11, %v322_v11 }
 0x105   : > { %v325_v13 = vpop.f32.mrb[2].mxu0 }
 0x106   : > { %v730_v14 = vpop.f32.mrb[3].mxu0 }
 0x174   : > { %v371_v15 = vpop.f32.mrb[0].mxu1 }
 0x175   : > { %v737_v16 = vpop.f32.mrb[1].mxu1 }
 0x176   : > { %v374_v17 = vpop.f32.mrb[2].mxu1 }
 0x177   : > { %v379_v18 = vpack.c.bf16 %v374_v17, %v371_v15  ;;  %v738_v19 = vpop.f32.mrb[3].mxu1 }
 0x179   : > { %v385_v20 = vsel %vm380_vm3, %v379_v18, 0  ;;  %450 = vrot.lane.b32.xlu0 %v379_v18, %s967_s29 }
 0x17a   : > { %740 = vmatpush3.bf16.xpose.msra.mxu0 %v385_v20 }
 0x17b   : > { %751 = vmatprep.subr.bf16.mxu0 %v968_v3 }
 0x181   : > { %742 = vmatmul.mubr.msk.bf16.vlgmr.msra.gmra.mrb[4].mxu0 %vm380_vm3, %v378_v21 }
 0x182   : > { %753 = vmatprep.mubr.msk.bf16.mxu0 %vm969_vm1, %v968_v3  ;;  %752 = vmatpush3.bf16.msra.mxu0 %v504_v41 }
 0x1eb   : > { %v451_v22 = vpop.permute.xlu0 %450 }
 0x1ec   : > { %746 = vmatpush3.bf16.msra.mxu1 %v451_v22 }
 0x254   : > { %v421_v28 = vpop.f32.mrb[4].mxu0 }
 0x255   : > { %v427_v29 = vmul.f32 0.35355338, %v421_v28  ;;  %v743_v30 = vpop.f32.mrb[5].mxu0 }
 0x256   : > { %v424_v31 = vpop.f32.mrb[6].mxu0 }
 0x257   : > { %v744_v32 = vpop.f32.mrb[7].mxu0  ;;  %v435_v33 = vsel %vm434_vm4, %v427_v29, -inf }
 0x258   : > { %v437_v34 = vsel %vm436_vm5, %v435_v33, -inf }
 0x259   : > { %438 = vmax.xlane.f32.xlu1 %v437_v34 }
 0x2e6   : > { %v439_v35 = vpop.xlane.xlu1 %438 }
 0x2e7   : > { %v440_v36 = vsub.f32 %v435_v33, %v439_v35 }
 0x2e9   : > { %v441_v37 = vmul.f32 1.442695, %v440_v36 }
 0x2eb   : > { %850 = vpow2.f32 %v441_v37 }
 0x2f5   : > { %v851_v38 = vpop.eup %850 }
 0x2f6   : > { %v443_v39 = vsel %vm436_vm5, %v851_v38, 0.0 }
 0x2f7   : > { %444 = vadd.xlane.f32.xlu1 %v443_v39 }
 0x384   : > { %v445_v42 = vpop.xlane.xlu1 %444 }
 0x385   : > { %852 = vrcp.f32 %v445_v42 }
 0x38f   : > { %v853_v43 = vpop.eup %852 }
 0x390   : > { %v447_v44 = vmul.f32 %v853_v43, %v851_v38 }
 0x392   : > { %v448_v45 = vpack.c.bf16 %v447_v44, %v447_v44 }
 0x394   : > { %748 = vmatmul.mubr.msk.bf16.vlgmr.msra.gmra.mrb[4].mxu1 %vm436_vm5, %v448_v45 }
 0x467   : > { %v490_v46 = vpop.f32.mrb[4].mxu1 }
 0x468   : > { %v497_v47 = vpack.c.bf16 %v490_v46, %v490_v46  ;;  %v749_v48 = vpop.f32.mrb[5].mxu1 }
 0x469   : > { %v493_v49 = vpop.f32.mrb[6].mxu1 }
 0x46a   : > { %v750_v50 = vpop.f32.mrb[7].mxu1  ;;  %754 = vmatmul.mubr.msk.bf16.vlgmr.msra.gmra.mrb[8].mxu0 %vm380_vm3, %v497_v47 }
 0x53a   : > { %551 = sbr.rel (%p702_p2) target bundleno = 1355 (0x54b), region = 44 }
 0x53d   : > { %v540_v52 = vpop.f32.mrb[8].mxu0 }
 0x53e   : > { %v546_v53 = vadd.f32 %v540_v52, %v496_v51  ;;  %v755_v54 = vpop.f32.mrb[9].mxu0 }
 0x53f   : > { %v543_v55 = vpop.f32.mrb[10].mxu0 }
 0x540   : > { %547 = vst.msk [vmem:[#allocation2] sm:$0xff] %vm284_vm2, %v546_v53  ;;  %v756_v56 = vpop.f32.mrb[11].mxu0 }
 0x547   : > { %v552_v57 = vld [vmem:[#allocation2] sm:$0xff] }
 0x548   : > { %v560_v59 = vadd.f32 %v703_v58, %v552_v57 }
 0x54a   : > { %561 = vst.msk [vmem:[%s239_s21] sm:$0xff] %vm284_vm2, %v560_v59 }
 0x54b PF: > { %s705_s11 = sshll.u32 %s948_s20, 1  ;;  %s578_s18 = sshll.u32 %s239_s21, 4  ;;  %s1142_s18 = int_to_ptr.vmem [resolvable:$true] %s578_s18 }
 0x54c   : > { %s574_s13 = sadd.s32 %s944_s19, %s705_s11  ;;  %s1218_s7 = sand.u32 1, %s932_s16  }
 0x54d   : > { %s706_s14 = sshll.u32 %s574_s13, 7  ;;  %s563_s8 = scalar_lea.sflag [#allocation4], %s1218_s7 }
 0x54e   : > { %s576_s6 = scalar_lea.hbm %s1203_s4, %s706_s14  ;;  %s854_s9 = scalar_lea.vmem %s1142_s18, 128 }
 0x54f   : > { %p855_p3 = scmp.ne.s32.totalorder %s1142_s18, %s854_s9  ;;  %s970_s19 = smov [#allocation3]  }
 0x550   : > { %s858_s20 = sshll.u32 %s970_s19, 4  ;;  %s859_s20 = int_to_ptr.vmem [resolvable:$false] %s858_s20 }
 0x551   : > { %p856_p4 = pnand %p855_p3, %p1058_p6  ;;  %s860_s21 = scalar_lea.vmem %s859_s20, 256 }
 0x552   : > { %p861_p8 = scmp.lt.s32.totalorder %s1142_s18, %s859_s20  ;;  %p862_p9 = scmp.lt.s32.totalorder %s860_s21, %s854_s9 }
 0x553   : > { %p857_p5 = pneg %p856_p4 }
 0x554   : > { %p863_p10 = por %p862_p9, %p861_p8 }
 0x556   : > { %p864_p11 = pnand %p863_p10, %p857_p5 }
 0x558   : > { %867 = shalt.err (!%p864_p11)
}
 0x559   : > { %s868_s12 = scalar_lea.hbm %s576_s6, 128  ;;  %s872_s23 = scalar_lea.hbm %s1203_s4, 512 }
 0x55a   : > { %p869_p12 = scmp.ne.s32.totalorder %s576_s6, %s868_s12  ;;  %p873_p1 = scmp.lt.u32.totalorder %s576_s6, %s1203_s4 }
 0x55b   : > { %p874_p2 = scmp.lt.u32.totalorder %s872_s23, %s868_s12  ;;  %p876_p4 = scmp.lt.u32.totalorder %s868_s12, %s576_s6 }
 0x55c   : > { %p870_p13 = pnand %p869_p12, %p1058_p6 }
 0x55d   : > { %p875_p3 = por %p874_p2, %p873_p1 }
 0x55e   : > { %p871_p0 = pneg %p870_p13 }
 0x55f   : > { %p877_p8 = por %p876_p4, %p875_p3 }
 0x561   : > { %p878_p5 = pnand %p877_p8, %p871_p0 }
 0x563   : > { %881 = shalt.err (!%p878_p5)
}
 0x564   : > { %757 = dma.vmem_to_hbm [thread:$0]  (%p1058_p6), %s1142_s18, 128, %s576_s6, %s563_s8  }
 0x565 PF: > { %p763_p9 = scmp.ge.s32.totalorder %s964_s24, 2  ;;  %s590_s11 = sand.u32 1, %s928_s15  }
 0x566   : > { %s591_s13 = scalar_lea.sflag [#allocation4], %s590_s11 }
 0x567   : > { %p760_p10 = pnand %p763_p9, %p1065_p7 }
 0x569   : > { %923 = dma.done.wait (!%p760_p10), %s591_s13, 128  }
 0x56a   : > { %925 = vsyncadd (!%p760_p10), %s591_s13, 4294967168  ;;  %s17_s24 = sadd.s32 1, %s964_s24   ;;  %s1219_s18 = sld [smem:[#allocation6_spill]] }
 0x56b   : > { %p14_p11 = scmp.ge.s32.totalorder %s17_s24, 18   ;;  %s1220_s19 = sld [smem:[#allocation7_spill]] }
 0x56c   : > { %s1221_s20 = sld [smem:[#allocation8_spill]]  ;;  %s1222_s21 = sld [smem:[#allocation9_spill]] }
 0x56d   : > { %s1223_s22 = sld [smem:[#allocation10_spill]]  ;;  %s1224_s23 = sld [smem:[#allocation11_spill]] }
 0x56e   : > { %s1225_s15 = smov %s932_s16  ;;  %s1226_s16 = smov %s936_s17 }
 0x56f   : > { %s1227_s17 = smov %s1079_s10  ;;  %16 = sbr.rel (!%p14_p11) target bundleno = 6 (0x6), region = 86 }
 0x576   :  { %596 = vsyncpa [#allocation4], 1 }
 0x577   :  { %598 = vsyncpa [#allocation4 + $0x1], 1 }

</bundles_post_ra>
